<compile_context>
chip_gen: v7x
topology: tpu7x:2x2x1
jax: 0.10.0
libtpu: 0.0.40
codegen_flags: <defaults>
</compile_context>

<pallas_src>
import functools

import jax
import jax.numpy as jnp
from jax import lax
from jax.experimental import pallas as pl
from jax.experimental.pallas import tpu as pltpu


def _bottleneck_kernel(x_ref, w1_ref, b1_ref, w2_ref, b2_ref, mask_ref, o_ref, *, W):
    # x_ref   : (1, C1, HW)   f32   one batch element, channels-first, spatial flattened (lanes)
    # w1_ref  : (C1, C1)      bf16  cv1 1x1 weight, (C_out, C_in)
    # b1_ref  : (C1, 1)       f32
    # w2_ref  : (C2, 25*C1)   bf16  cv2 5x5 weight, K ordered (tap-major, c_in-minor)
    # b2_ref  : (C2, 1)       f32
    # mask_ref: (25, 1, HW)   f32   per-tap validity mask over flattened spatial lanes
    # o_ref   : (1, C2, HW)
    HW = x_ref.shape[2]

    x = x_ref[0]                                                 # (C1, HW) f32

    # ---- cv1: 1x1 conv == channel matmul; lane dim = HW (lane-dense) ----
    h1 = jnp.dot(w1_ref[...], x.astype(jnp.bfloat16),
                 preferred_element_type=jnp.float32) + b1_ref[...]   # (C1, HW) f32

    # ---- cv2: 5x5 conv (stride=1, pad=2) as ONE im2col matmul, K = 25*C1 ----
    # Patch slab rows: per-tap spatially-shifted h1 (circular lane roll on the XLU)
    # with out-of-bounds positions zeroed by a precomputed mask.
    rows = []
    for t in range(25):
        ki, kj = divmod(t, 5)
        s = (ki - 2) * W + (kj - 2)                              # lane offset for this tap
        if s == 0:
            rows.append(h1)                                      # center tap: no shift, all valid
        else:
            shifted = pltpu.roll(h1, shift=(-s) % HW, axis=1)    # shifted[:, l] = h1[:, l + s]
            rows.append(shifted * mask_ref[t])                   # (C1, HW)
    slab = jnp.concatenate(rows, axis=0).astype(jnp.bfloat16)    # (25*C1, HW)

    acc = jnp.dot(w2_ref[...], slab,
                  preferred_element_type=jnp.float32) + b2_ref[...]  # (C2, HW) f32

    # ---- residual shortcut (self.add == True, C1 == C2) ----
    o_ref[0] = (acc + x).astype(o_ref.dtype)


def super_bottleneck_pallas(x_nchw, w1_mat, b1, w2_mat, b2):
    """x_nchw: (N, C1, H, W) f32 (PyTorch layout, kept as-is)
       w1_mat: (C1, C1)      cv1 weight as (C_out, C_in)
       w2_mat: (C2, 25*C1)   cv2 weight, K ordered (tap-major, c_in-minor)
       returns (N, C2, H, W)"""
    N, C1, H, W = x_nchw.shape
    C2 = w2_mat.shape[0]
    HW = H * W

    x = x_nchw.reshape(N, C1, HW)                 # pure reshape, no transpose

    # Per-tap boundary validity masks over flattened spatial lanes (static).
    lane = jnp.arange(HW)
    ii, jj = lane // W, lane % W
    masks = []
    for t in range(25):
        ki, kj = divmod(t, 5)
        di, dj = ki - 2, kj - 2
        valid = (ii + di >= 0) & (ii + di < H) & (jj + dj >= 0) & (jj + dj < W)
        masks.append(valid)
    mask = jnp.stack(masks).astype(jnp.float32).reshape(25, 1, HW)

    kernel = functools.partial(_bottleneck_kernel, W=W)

    # TODO(synk): for production shapes (large H*W / channels) add an H-tiled grid
    # axis with a 2-row halo instead of whole-image blocks (v7x 64 MiB VMEM).
    out = pl.pallas_call(
        kernel,
        out_shape=jax.ShapeDtypeStruct((N, C2, HW), x_nchw.dtype),
        grid_spec=pltpu.PrefetchScalarGridSpec(
            num_scalar_prefetch=0,
            grid=(N,),
            in_specs=[
                pl.BlockSpec((1, C1, HW), lambda n: (n, 0, 0)),
                pl.BlockSpec((C1, C1), lambda n: (0, 0)),
                pl.BlockSpec((C1, 1), lambda n: (0, 0)),
                pl.BlockSpec((C2, 25 * C1), lambda n: (0, 0)),
                pl.BlockSpec((C2, 1), lambda n: (0, 0)),
                pl.BlockSpec((25, 1, HW), lambda n: (0, 0, 0)),
            ],
            out_specs=pl.BlockSpec((1, C2, HW), lambda n: (n, 0, 0)),
        ),
        compiler_params=pltpu.CompilerParams(dimension_semantics=("parallel",)),
    )(
        x,
        w1_mat.astype(jnp.bfloat16),
        b1.reshape(C1, 1).astype(jnp.float32),
        w2_mat.astype(jnp.bfloat16),
        b2.reshape(C2, 1).astype(jnp.float32),
        mask,
    )
    return out.reshape(N, C2, H, W)


# ------------------------- parameter / mask glue (plain JAX) -------------------------

def kaiming_normal_fan_out(key, shape):
    # PyTorch kaiming_normal_(mode='fan_out'), gain = sqrt(2)
    fan_out = shape[0] * shape[2] * shape[3]
    std = (2.0 / fan_out) ** 0.5
    return std * jax.random.normal(key, shape, dtype=jnp.float32)


def gumbel_softmax_hard(key, logits, tau=0.1):
    # Forward semantics of F.gumbel_softmax(..., hard=True): one-hot of argmax
    # of (logits + gumbel)/tau, with gumbel noise drawn from a fixed JAX key.
    u = jax.random.uniform(key, logits.shape, minval=1e-6, maxval=1.0 - 1e-6)
    g = -jnp.log(-jnp.log(u))
    y = jax.nn.softmax((logits + g) / tau)
    return jax.nn.one_hot(jnp.argmax(y), logits.shape[0], dtype=logits.dtype)


def channel_mask(out_channels_list, max_oc, onehot):
    masks = jnp.stack([
        jnp.concatenate([jnp.ones((oc,), jnp.float32),
                         jnp.zeros((max_oc - oc,), jnp.float32)])
        for oc in out_channels_list])                        # (K, max_oc)
    return (masks * onehot[:, None]).sum(0)                  # (max_oc,)


def kernel_mask_sum(kernel_size_list, max_k, kernel_scores):
    masks = []
    for ks in kernel_size_list:
        if ks == 'dilated':
            m = jnp.zeros((max_k, max_k)).at[0::2, 0::2].set(1.0)
        else:
            p = (max_k - ks) // 2
            m = jnp.zeros((max_k, max_k)).at[p:p + ks, p:p + ks].set(1.0)
        masks.append(m)
    masks = jnp.stack(masks)                                 # (K, max_k, max_k)
    sig = jax.nn.sigmoid(kernel_scores)                      # sigmoid(0) = 0.5
    return (masks * sig[:, None, None]).sum(0)               # (max_k, max_k)


if __name__ == "__main__":
    key = jax.random.PRNGKey(0)
    N, C1, H, W = 2, 8, 16, 16
    C2 = C1                                                  # shortcut active (c1 == c2)
    e_list = [0.5, 0.75, 1.0]
    oc_list1 = [int(e * C1) for e in e_list]                 # cv1 out-channel candidates
    oc_list2 = [int(e * C2) for e in e_list]                 # cv2 out-channel candidates
    ks_list = [1, 3, 5, 'dilated']
    max_k = 5

    kx, kw1, kw2, kg1, kg2 = jax.random.split(key, 5)
    x = jax.random.normal(kx, (N, C1, H, W), dtype=jnp.float32)

    # cv1 parameters (1x1 conv, channel search)
    w1_raw = kaiming_normal_fan_out(kw1, (C1, C1, 1, 1))
    b1 = jnp.zeros((C1,), jnp.float32)
    onehot1 = gumbel_softmax_hard(kg1, jnp.zeros((len(oc_list1),), jnp.float32))
    cmask1 = channel_mask(oc_list1, C1, onehot1)
    w1_eff = w1_raw * cmask1[:, None, None, None]            # OIHW

    # cv2 parameters (5x5 conv, channel + kernel-size search)
    w2_raw = kaiming_normal_fan_out(kw2, (C2, C1, max_k, max_k))
    b2 = jnp.zeros((C2,), jnp.float32)
    onehot2 = gumbel_softmax_hard(kg2, jnp.zeros((len(oc_list2),), jnp.float32))
    cmask2 = channel_mask(oc_list2, C2, onehot2)
    kmask = kernel_mask_sum(ks_list, max_k, jnp.zeros((len(ks_list),), jnp.float32))
    w2_eff = w2_raw * cmask2[:, None, None, None] * kmask[None, None, :, :]

    # repack weights for the channels-first / spatial-as-lane kernel
    w1_mat = w1_eff[:, :, 0, 0]                                        # (C_out, C_in)
    w2_mat = jnp.transpose(w2_eff, (0, 2, 3, 1)).reshape(C2, max_k * max_k * C1)

    out = jax.block_until_ready(super_bottleneck_pallas(x, w1_mat, b1, w2_mat, b2))

    # pure-JAX f32 reference (NCHW, same as PyTorch F.conv2d semantics)
    y1 = lax.conv_general_dilated(x, w1_eff, (1, 1), 'VALID',
                                  dimension_numbers=('NCHW', 'OIHW', 'NCHW'))
    y1 = y1 + b1[None, :, None, None]
    y2 = lax.conv_general_dilated(y1, w2_eff, (1, 1), ((2, 2), (2, 2)),
                                  dimension_numbers=('NCHW', 'OIHW', 'NCHW'))
    y2 = y2 + b2[None, :, None, None]
    ref = x + y2

    # bf16 matmul operands (f32 accumulation) -> compare with a relative-to-max tolerance
    rel_err = jnp.max(jnp.abs(out - ref)) / (jnp.max(jnp.abs(ref)) + 1e-6)
    assert float(rel_err) < 2.5e-2, float(rel_err)
    print("KERNEL_OK")
</pallas_src>

<mosaic_0001>
module attributes {stable_mosaic.version = 11 : i64} {
  func.func @_bottleneck_kernel(%arg0: i32, %arg1: memref<1x8x256xf32, #tpu.memory_space<vmem>>, %arg2: memref<8x8xbf16, #tpu.memory_space<vmem>>, %arg3: memref<8x1xf32, #tpu.memory_space<vmem>>, %arg4: memref<8x200xbf16, #tpu.memory_space<vmem>>, %arg5: memref<8x1xf32, #tpu.memory_space<vmem>>, %arg6: memref<25x1x256xf32, #tpu.memory_space<vmem>>, %arg7: memref<1x8x256xf32, #tpu.memory_space<vmem>>) attributes {dimension_semantics = [#tpu.dimension_semantics<parallel>], iteration_bounds = array<i64: 2>, scalar_prefetch = 0 : i64, scratch_operands = 0 : i64, tpu.core_type = #tpu.core_type<tc>, window_params = [{transform_indices = @transform_0, window_bounds = array<i64: 1, 8, 256>}, {pipeline_mode = #tpu.pipeline_mode<synchronous>, transform_indices = @transform_1, window_bounds = array<i64: 8, 8>}, {pipeline_mode = #tpu.pipeline_mode<synchronous>, transform_indices = @transform_2, window_bounds = array<i64: 8, 1>}, {pipeline_mode = #tpu.pipeline_mode<synchronous>, transform_indices = @transform_3, window_bounds = array<i64: 8, 200>}, {pipeline_mode = #tpu.pipeline_mode<synchronous>, transform_indices = @transform_4, window_bounds = array<i64: 8, 1>}, {pipeline_mode = #tpu.pipeline_mode<synchronous>, transform_indices = @transform_5, window_bounds = array<i64: 25, 1, 256>}, {transform_indices = @transform_6, window_bounds = array<i64: 1, 8, 256>}]} {
    %c0 = arith.constant 0 : index
    %c0_0 = arith.constant 0 : index
    %c0_1 = arith.constant 0 : index
    %0 = vector.load %arg1[%c0, %c0_0, %c0_1] : memref<1x8x256xf32, #tpu.memory_space<vmem>>, vector<1x8x256xf32>
    %1 = vector.shape_cast %0 : vector<1x8x256xf32> to vector<8x256xf32>
    %c0_2 = arith.constant 0 : index
    %c0_3 = arith.constant 0 : index
    %2 = vector.load %arg2[%c0_2, %c0_3] : memref<8x8xbf16, #tpu.memory_space<vmem>>, vector<8x8xbf16>
    %3 = arith.truncf %1 : vector<8x256xf32> to vector<8x256xbf16>
    %cst = arith.constant dense<0.000000e+00> : vector<8x256xf32>
    %4 = tpu.matmul %2, %3, %cst {dimension_numbers = #tpu.dot_dimension_numbers<[1], [0], [0], [1], [0, 0, 1, 1], [], []>} : vector<8x8xbf16>, vector<8x256xbf16>, vector<8x256xf32> -> vector<8x256xf32>
    %c0_4 = arith.constant 0 : index
    %c0_5 = arith.constant 0 : index
    %5 = vector.load %arg3[%c0_4, %c0_5] : memref<8x1xf32, #tpu.memory_space<vmem>>, vector<8x1xf32>
    %6 = vector.broadcast %5 : vector<8x1xf32> to vector<8x256xf32>
    %7 = arith.addf %4, %6 : vector<8x256xf32>
    %c34_i32 = arith.constant 34 : i32
    %8 = tpu.dynamic_rotate %7 by %c34_i32 dim 1 : vector<8x256xf32>, i32 -> vector<8x256xf32>
    %c0_6 = arith.constant 0 : index
    %c0_7 = arith.constant 0 : index
    %c0_8 = arith.constant 0 : index
    %9 = vector.load %arg6[%c0_6, %c0_7, %c0_8] : memref<25x1x256xf32, #tpu.memory_space<vmem>>, vector<1x1x256xf32>
    %10 = vector.shape_cast %9 : vector<1x1x256xf32> to vector<1x256xf32>
    %11 = vector.broadcast %10 : vector<1x256xf32> to vector<8x256xf32>
    %12 = arith.mulf %8, %11 : vector<8x256xf32>
    %c33_i32 = arith.constant 33 : i32
    %13 = tpu.dynamic_rotate %7 by %c33_i32 dim 1 : vector<8x256xf32>, i32 -> vector<8x256xf32>
    %c1 = arith.constant 1 : index
    %c0_9 = arith.constant 0 : index
    %c0_10 = arith.constant 0 : index
    %14 = vector.load %arg6[%c1, %c0_9, %c0_10] : memref<25x1x256xf32, #tpu.memory_space<vmem>>, vector<1x1x256xf32>
    %15 = vector.shape_cast %14 : vector<1x1x256xf32> to vector<1x256xf32>
    %16 = vector.broadcast %15 : vector<1x256xf32> to vector<8x256xf32>
    %17 = arith.mulf %13, %16 : vector<8x256xf32>
    %c32_i32 = arith.constant 32 : i32
    %18 = tpu.dynamic_rotate %7 by %c32_i32 dim 1 : vector<8x256xf32>, i32 -> vector<8x256xf32>
    %c2 = arith.constant 2 : index
    %c0_11 = arith.constant 0 : index
    %c0_12 = arith.constant 0 : index
    %19 = vector.load %arg6[%c2, %c0_11, %c0_12] : memref<25x1x256xf32, #tpu.memory_space<vmem>>, vector<1x1x256xf32>
    %20 = vector.shape_cast %19 : vector<1x1x256xf32> to vector<1x256xf32>
    %21 = vector.broadcast %20 : vector<1x256xf32> to vector<8x256xf32>
    %22 = arith.mulf %18, %21 : vector<8x256xf32>
    %c31_i32 = arith.constant 31 : i32
    %23 = tpu.dynamic_rotate %7 by %c31_i32 dim 1 : vector<8x256xf32>, i32 -> vector<8x256xf32>
    %c3 = arith.constant 3 : index
    %c0_13 = arith.constant 0 : index
    %c0_14 = arith.constant 0 : index
    %24 = vector.load %arg6[%c3, %c0_13, %c0_14] : memref<25x1x256xf32, #tpu.memory_space<vmem>>, vector<1x1x256xf32>
    %25 = vector.shape_cast %24 : vector<1x1x256xf32> to vector<1x256xf32>
    %26 = vector.broadcast %25 : vector<1x256xf32> to vector<8x256xf32>
    %27 = arith.mulf %23, %26 : vector<8x256xf32>
    %c30_i32 = arith.constant 30 : i32
    %28 = tpu.dynamic_rotate %7 by %c30_i32 dim 1 : vector<8x256xf32>, i32 -> vector<8x256xf32>
    %c4 = arith.constant 4 : index
    %c0_15 = arith.constant 0 : index
    %c0_16 = arith.constant 0 : index
    %29 = vector.load %arg6[%c4, %c0_15, %c0_16] : memref<25x1x256xf32, #tpu.memory_space<vmem>>, vector<1x1x256xf32>
    %30 = vector.shape_cast %29 : vector<1x1x256xf32> to vector<1x256xf32>
    %31 = vector.broadcast %30 : vector<1x256xf32> to vector<8x256xf32>
    %32 = arith.mulf %28, %31 : vector<8x256xf32>
    %c18_i32 = arith.constant 18 : i32
    %33 = tpu.dynamic_rotate %7 by %c18_i32 dim 1 : vector<8x256xf32>, i32 -> vector<8x256xf32>
    %c5 = arith.constant 5 : index
    %c0_17 = arith.constant 0 : index
    %c0_18 = arith.constant 0 : index
    %34 = vector.load %arg6[%c5, %c0_17, %c0_18] : memref<25x1x256xf32, #tpu.memory_space<vmem>>, vector<1x1x256xf32>
    %35 = vector.shape_cast %34 : vector<1x1x256xf32> to vector<1x256xf32>
    %36 = vector.broadcast %35 : vector<1x256xf32> to vector<8x256xf32>
    %37 = arith.mulf %33, %36 : vector<8x256xf32>
    %c17_i32 = arith.constant 17 : i32
    %38 = tpu.dynamic_rotate %7 by %c17_i32 dim 1 : vector<8x256xf32>, i32 -> vector<8x256xf32>
    %c6 = arith.constant 6 : index
    %c0_19 = arith.constant 0 : index
    %c0_20 = arith.constant 0 : index
    %39 = vector.load %arg6[%c6, %c0_19, %c0_20] : memref<25x1x256xf32, #tpu.memory_space<vmem>>, vector<1x1x256xf32>
    %40 = vector.shape_cast %39 : vector<1x1x256xf32> to vector<1x256xf32>
    %41 = vector.broadcast %40 : vector<1x256xf32> to vector<8x256xf32>
    %42 = arith.mulf %38, %41 : vector<8x256xf32>
    %c16_i32 = arith.constant 16 : i32
    %43 = tpu.dynamic_rotate %7 by %c16_i32 dim 1 : vector<8x256xf32>, i32 -> vector<8x256xf32>
    %c7 = arith.constant 7 : index
    %c0_21 = arith.constant 0 : index
    %c0_22 = arith.constant 0 : index
    %44 = vector.load %arg6[%c7, %c0_21, %c0_22] : memref<25x1x256xf32, #tpu.memory_space<vmem>>, vector<1x1x256xf32>
    %45 = vector.shape_cast %44 : vector<1x1x256xf32> to vector<1x256xf32>
    %46 = vector.broadcast %45 : vector<1x256xf32> to vector<8x256xf32>
    %47 = arith.mulf %43, %46 : vector<8x256xf32>
    %c15_i32 = arith.constant 15 : i32
    %48 = tpu.dynamic_rotate %7 by %c15_i32 dim 1 : vector<8x256xf32>, i32 -> vector<8x256xf32>
    %c8 = arith.constant 8 : index
    %c0_23 = arith.constant 0 : index
    %c0_24 = arith.constant 0 : index
    %49 = vector.load %arg6[%c8, %c0_23, %c0_24] : memref<25x1x256xf32, #tpu.memory_space<vmem>>, vector<1x1x256xf32>
    %50 = vector.shape_cast %49 : vector<1x1x256xf32> to vector<1x256xf32>
    %51 = vector.broadcast %50 : vector<1x256xf32> to vector<8x256xf32>
    %52 = arith.mulf %48, %51 : vector<8x256xf32>
    %c14_i32 = arith.constant 14 : i32
    %53 = tpu.dynamic_rotate %7 by %c14_i32 dim 1 : vector<8x256xf32>, i32 -> vector<8x256xf32>
    %c9 = arith.constant 9 : index
    %c0_25 = arith.constant 0 : index
    %c0_26 = arith.constant 0 : index
    %54 = vector.load %arg6[%c9, %c0_25, %c0_26] : memref<25x1x256xf32, #tpu.memory_space<vmem>>, vector<1x1x256xf32>
    %55 = vector.shape_cast %54 : vector<1x1x256xf32> to vector<1x256xf32>
    %56 = vector.broadcast %55 : vector<1x256xf32> to vector<8x256xf32>
    %57 = arith.mulf %53, %56 : vector<8x256xf32>
    %c2_i32 = arith.constant 2 : i32
    %58 = tpu.dynamic_rotate %7 by %c2_i32 dim 1 : vector<8x256xf32>, i32 -> vector<8x256xf32>
    %c10 = arith.constant 10 : index
    %c0_27 = arith.constant 0 : index
    %c0_28 = arith.constant 0 : index
    %59 = vector.load %arg6[%c10, %c0_27, %c0_28] : memref<25x1x256xf32, #tpu.memory_space<vmem>>, vector<1x1x256xf32>
    %60 = vector.shape_cast %59 : vector<1x1x256xf32> to vector<1x256xf32>
    %61 = vector.broadcast %60 : vector<1x256xf32> to vector<8x256xf32>
    %62 = arith.mulf %58, %61 : vector<8x256xf32>
    %c1_i32 = arith.constant 1 : i32
    %63 = tpu.dynamic_rotate %7 by %c1_i32 dim 1 : vector<8x256xf32>, i32 -> vector<8x256xf32>
    %c11 = arith.constant 11 : index
    %c0_29 = arith.constant 0 : index
    %c0_30 = arith.constant 0 : index
    %64 = vector.load %arg6[%c11, %c0_29, %c0_30] : memref<25x1x256xf32, #tpu.memory_space<vmem>>, vector<1x1x256xf32>
    %65 = vector.shape_cast %64 : vector<1x1x256xf32> to vector<1x256xf32>
    %66 = vector.broadcast %65 : vector<1x256xf32> to vector<8x256xf32>
    %67 = arith.mulf %63, %66 : vector<8x256xf32>
    %c255_i32 = arith.constant 255 : i32
    %68 = tpu.dynamic_rotate %7 by %c255_i32 dim 1 : vector<8x256xf32>, i32 -> vector<8x256xf32>
    %c13 = arith.constant 13 : index
    %c0_31 = arith.constant 0 : index
    %c0_32 = arith.constant 0 : index
    %69 = vector.load %arg6[%c13, %c0_31, %c0_32] : memref<25x1x256xf32, #tpu.memory_space<vmem>>, vector<1x1x256xf32>
    %70 = vector.shape_cast %69 : vector<1x1x256xf32> to vector<1x256xf32>
    %71 = vector.broadcast %70 : vector<1x256xf32> to vector<8x256xf32>
    %72 = arith.mulf %68, %71 : vector<8x256xf32>
    %c254_i32 = arith.constant 254 : i32
    %73 = tpu.dynamic_rotate %7 by %c254_i32 dim 1 : vector<8x256xf32>, i32 -> vector<8x256xf32>
    %c14 = arith.constant 14 : index
    %c0_33 = arith.constant 0 : index
    %c0_34 = arith.constant 0 : index
    %74 = vector.load %arg6[%c14, %c0_33, %c0_34] : memref<25x1x256xf32, #tpu.memory_space<vmem>>, vector<1x1x256xf32>
    %75 = vector.shape_cast %74 : vector<1x1x256xf32> to vector<1x256xf32>
    %76 = vector.broadcast %75 : vector<1x256xf32> to vector<8x256xf32>
    %77 = arith.mulf %73, %76 : vector<8x256xf32>
    %c242_i32 = arith.constant 242 : i32
    %78 = tpu.dynamic_rotate %7 by %c242_i32 dim 1 : vector<8x256xf32>, i32 -> vector<8x256xf32>
    %c15 = arith.constant 15 : index
    %c0_35 = arith.constant 0 : index
    %c0_36 = arith.constant 0 : index
    %79 = vector.load %arg6[%c15, %c0_35, %c0_36] : memref<25x1x256xf32, #tpu.memory_space<vmem>>, vector<1x1x256xf32>
    %80 = vector.shape_cast %79 : vector<1x1x256xf32> to vector<1x256xf32>
    %81 = vector.broadcast %80 : vector<1x256xf32> to vector<8x256xf32>
    %82 = arith.mulf %78, %81 : vector<8x256xf32>
    %c241_i32 = arith.constant 241 : i32
    %83 = tpu.dynamic_rotate %7 by %c241_i32 dim 1 : vector<8x256xf32>, i32 -> vector<8x256xf32>
    %c16 = arith.constant 16 : index
    %c0_37 = arith.constant 0 : index
    %c0_38 = arith.constant 0 : index
    %84 = vector.load %arg6[%c16, %c0_37, %c0_38] : memref<25x1x256xf32, #tpu.memory_space<vmem>>, vector<1x1x256xf32>
    %85 = vector.shape_cast %84 : vector<1x1x256xf32> to vector<1x256xf32>
    %86 = vector.broadcast %85 : vector<1x256xf32> to vector<8x256xf32>
    %87 = arith.mulf %83, %86 : vector<8x256xf32>
    %c240_i32 = arith.constant 240 : i32
    %88 = tpu.dynamic_rotate %7 by %c240_i32 dim 1 : vector<8x256xf32>, i32 -> vector<8x256xf32>
    %c17 = arith.constant 17 : index
    %c0_39 = arith.constant 0 : index
    %c0_40 = arith.constant 0 : index
    %89 = vector.load %arg6[%c17, %c0_39, %c0_40] : memref<25x1x256xf32, #tpu.memory_space<vmem>>, vector<1x1x256xf32>
    %90 = vector.shape_cast %89 : vector<1x1x256xf32> to vector<1x256xf32>
    %91 = vector.broadcast %90 : vector<1x256xf32> to vector<8x256xf32>
    %92 = arith.mulf %88, %91 : vector<8x256xf32>
    %c239_i32 = arith.constant 239 : i32
    %93 = tpu.dynamic_rotate %7 by %c239_i32 dim 1 : vector<8x256xf32>, i32 -> vector<8x256xf32>
    %c18 = arith.constant 18 : index
    %c0_41 = arith.constant 0 : index
    %c0_42 = arith.constant 0 : index
    %94 = vector.load %arg6[%c18, %c0_41, %c0_42] : memref<25x1x256xf32, #tpu.memory_space<vmem>>, vector<1x1x256xf32>
    %95 = vector.shape_cast %94 : vector<1x1x256xf32> to vector<1x256xf32>
    %96 = vector.broadcast %95 : vector<1x256xf32> to vector<8x256xf32>
    %97 = arith.mulf %93, %96 : vector<8x256xf32>
    %c238_i32 = arith.constant 238 : i32
    %98 = tpu.dynamic_rotate %7 by %c238_i32 dim 1 : vector<8x256xf32>, i32 -> vector<8x256xf32>
    %c19 = arith.constant 19 : index
    %c0_43 = arith.constant 0 : index
    %c0_44 = arith.constant 0 : index
    %99 = vector.load %arg6[%c19, %c0_43, %c0_44] : memref<25x1x256xf32, #tpu.memory_space<vmem>>, vector<1x1x256xf32>
    %100 = vector.shape_cast %99 : vector<1x1x256xf32> to vector<1x256xf32>
    %101 = vector.broadcast %100 : vector<1x256xf32> to vector<8x256xf32>
    %102 = arith.mulf %98, %101 : vector<8x256xf32>
    %c226_i32 = arith.constant 226 : i32
    %103 = tpu.dynamic_rotate %7 by %c226_i32 dim 1 : vector<8x256xf32>, i32 -> vector<8x256xf32>
    %c20 = arith.constant 20 : index
    %c0_45 = arith.constant 0 : index
    %c0_46 = arith.constant 0 : index
    %104 = vector.load %arg6[%c20, %c0_45, %c0_46] : memref<25x1x256xf32, #tpu.memory_space<vmem>>, vector<1x1x256xf32>
    %105 = vector.shape_cast %104 : vector<1x1x256xf32> to vector<1x256xf32>
    %106 = vector.broadcast %105 : vector<1x256xf32> to vector<8x256xf32>
    %107 = arith.mulf %103, %106 : vector<8x256xf32>
    %c225_i32 = arith.constant 225 : i32
    %108 = tpu.dynamic_rotate %7 by %c225_i32 dim 1 : vector<8x256xf32>, i32 -> vector<8x256xf32>
    %c21 = arith.constant 21 : index
    %c0_47 = arith.constant 0 : index
    %c0_48 = arith.constant 0 : index
    %109 = vector.load %arg6[%c21, %c0_47, %c0_48] : memref<25x1x256xf32, #tpu.memory_space<vmem>>, vector<1x1x256xf32>
    %110 = vector.shape_cast %109 : vector<1x1x256xf32> to vector<1x256xf32>
    %111 = vector.broadcast %110 : vector<1x256xf32> to vector<8x256xf32>
    %112 = arith.mulf %108, %111 : vector<8x256xf32>
    %c224_i32 = arith.constant 224 : i32
    %113 = tpu.dynamic_rotate %7 by %c224_i32 dim 1 : vector<8x256xf32>, i32 -> vector<8x256xf32>
    %c22 = arith.constant 22 : index
    %c0_49 = arith.constant 0 : index
    %c0_50 = arith.constant 0 : index
    %114 = vector.load %arg6[%c22, %c0_49, %c0_50] : memref<25x1x256xf32, #tpu.memory_space<vmem>>, vector<1x1x256xf32>
    %115 = vector.shape_cast %114 : vector<1x1x256xf32> to vector<1x256xf32>
    %116 = vector.broadcast %115 : vector<1x256xf32> to vector<8x256xf32>
    %117 = arith.mulf %113, %116 : vector<8x256xf32>
    %c223_i32 = arith.constant 223 : i32
    %118 = tpu.dynamic_rotate %7 by %c223_i32 dim 1 : vector<8x256xf32>, i32 -> vector<8x256xf32>
    %c23 = arith.constant 23 : index
    %c0_51 = arith.constant 0 : index
    %c0_52 = arith.constant 0 : index
    %119 = vector.load %arg6[%c23, %c0_51, %c0_52] : memref<25x1x256xf32, #tpu.memory_space<vmem>>, vector<1x1x256xf32>
    %120 = vector.shape_cast %119 : vector<1x1x256xf32> to vector<1x256xf32>
    %121 = vector.broadcast %120 : vector<1x256xf32> to vector<8x256xf32>
    %122 = arith.mulf %118, %121 : vector<8x256xf32>
    %c222_i32 = arith.constant 222 : i32
    %123 = tpu.dynamic_rotate %7 by %c222_i32 dim 1 : vector<8x256xf32>, i32 -> vector<8x256xf32>
    %c24 = arith.constant 24 : index
    %c0_53 = arith.constant 0 : index
    %c0_54 = arith.constant 0 : index
    %124 = vector.load %arg6[%c24, %c0_53, %c0_54] : memref<25x1x256xf32, #tpu.memory_space<vmem>>, vector<1x1x256xf32>
    %125 = vector.shape_cast %124 : vector<1x1x256xf32> to vector<1x256xf32>
    %126 = vector.broadcast %125 : vector<1x256xf32> to vector<8x256xf32>
    %127 = arith.mulf %123, %126 : vector<8x256xf32>
    %128 = tpu.concatenate %12, %17, %22, %27, %32, %37, %42, %47, %52, %57, %62, %67, %7, %72, %77, %82 in 0 : vector<8x256xf32>, vector<8x256xf32>, vector<8x256xf32>, vector<8x256xf32>, vector<8x256xf32>, vector<8x256xf32>, vector<8x256xf32>, vector<8x256xf32>, vector<8x256xf32>, vector<8x256xf32>, vector<8x256xf32>, vector<8x256xf32>, vector<8x256xf32>, vector<8x256xf32>, vector<8x256xf32>, vector<8x256xf32> -> vector<128x256xf32>
    %129 = tpu.concatenate %87, %92, %97, %102, %107, %112, %117, %122, %127 in 0 : vector<8x256xf32>, vector<8x256xf32>, vector<8x256xf32>, vector<8x256xf32>, vector<8x256xf32>, vector<8x256xf32>, vector<8x256xf32>, vector<8x256xf32>, vector<8x256xf32> -> vector<72x256xf32>
    %130 = tpu.concatenate %128, %129 in 0 : vector<128x256xf32>, vector<72x256xf32> -> vector<200x256xf32>
    %131 = arith.truncf %130 : vector<200x256xf32> to vector<200x256xbf16>
    %c0_55 = arith.constant 0 : index
    %c0_56 = arith.constant 0 : index
    %132 = vector.load %arg4[%c0_55, %c0_56] : memref<8x200xbf16, #tpu.memory_space<vmem>>, vector<8x200xbf16>
    %cst_57 = arith.constant dense<0.000000e+00> : vector<8x256xf32>
    %133 = tpu.matmul %132, %131, %cst_57 {dimension_numbers = #tpu.dot_dimension_numbers<[1], [0], [0], [1], [0, 0, 1, 1], [], []>} : vector<8x200xbf16>, vector<200x256xbf16>, vector<8x256xf32> -> vector<8x256xf32>
    %c0_58 = arith.constant 0 : index
    %c0_59 = arith.constant 0 : index
    %134 = vector.load %arg5[%c0_58, %c0_59] : memref<8x1xf32, #tpu.memory_space<vmem>>, vector<8x1xf32>
    %135 = vector.broadcast %134 : vector<8x1xf32> to vector<8x256xf32>
    %136 = arith.addf %133, %135 : vector<8x256xf32>
    %137 = arith.addf %136, %1 : vector<8x256xf32>
    %c0_60 = arith.constant 0 : index
    %c0_61 = arith.constant 0 : index
    %c0_62 = arith.constant 0 : index
    %138 = vector.load %arg7[%c0_60, %c0_61, %c0_62] : memref<1x8x256xf32, #tpu.memory_space<vmem>>, vector<1x8x256xf32>
    %139 = vector.shape_cast %138 : vector<1x8x256xf32> to vector<8x256xf32>
    %140 = vector.shape_cast %137 : vector<8x256xf32> to vector<1x8x256xf32>
    tpu.vector_store %arg7[%c0_60, %c0_61, %c0_62], %140 {strides = array<i32>} : memref<1x8x256xf32, #tpu.memory_space<vmem>>, vector<1x8x256xf32>,
    return
  }
  func.func @transform_0(%arg0: i32) -> (i32, i32, i32) {
    %c0_i32 = arith.constant 0 : i32
    %c0_i32_0 = arith.constant 0 : i32
    %c0_i32_1 = arith.constant 0 : i32
    return %arg0, %c0_i32, %c0_i32_0 : i32, i32, i32
  }
  func.func @transform_1(%arg0: i32) -> (i32, i32) {
    %c0_i32 = arith.constant 0 : i32
    %c0_i32_0 = arith.constant 0 : i32
    %c0_i32_1 = arith.constant 0 : i32
    return %c0_i32, %c0_i32_0 : i32, i32
  }
  func.func @transform_2(%arg0: i32) -> (i32, i32) {
    %c0_i32 = arith.constant 0 : i32
    %c0_i32_0 = arith.constant 0 : i32
    %c0_i32_1 = arith.constant 0 : i32
    return %c0_i32, %c0_i32_0 : i32, i32
  }
  func.func @transform_3(%arg0: i32) -> (i32, i32) {
    %c0_i32 = arith.constant 0 : i32
    %c0_i32_0 = arith.constant 0 : i32
    %c0_i32_1 = arith.constant 0 : i32
    return %c0_i32, %c0_i32_0 : i32, i32
  }
  func.func @transform_4(%arg0: i32) -> (i32, i32) {
    %c0_i32 = arith.constant 0 : i32
    %c0_i32_0 = arith.constant 0 : i32
    %c0_i32_1 = arith.constant 0 : i32
    return %c0_i32, %c0_i32_0 : i32, i32
  }
  func.func @transform_5(%arg0: i32) -> (i32, i32, i32) {
    %c0_i32 = arith.constant 0 : i32
    %c0_i32_0 = arith.constant 0 : i32
    %c0_i32_1 = arith.constant 0 : i32
    %c0_i32_2 = arith.constant 0 : i32
    return %c0_i32, %c0_i32_0, %c0_i32_1 : i32, i32, i32
  }
  func.func @transform_6(%arg0: i32) -> (i32, i32, i32) {
    %c0_i32 = arith.constant 0 : i32
    %c0_i32_0 = arith.constant 0 : i32
    %c0_i32_1 = arith.constant 0 : i32
    return %arg0, %c0_i32, %c0_i32_0 : i32, i32, i32
  }
}

</mosaic_0001>

<bundles_post_ra>
// kernel: tpu_custom_call.1
= control target key start
LH: loop header
LB: loop body
LE: loop exit
PB: predicated region body
PF: predicated region fallthrough
CT: control target
= control target key end

     0   :  { %11 = vsyncpa [#allocation3], 0  ;;  %s1918_s0 = inlined_call_operand.hbm [shape: f32[2,8,256], index: 0, kind: input, shape index: {}]   ;;  %s1919_s1 = inlined_call_operand.vmem [shape: bf16[8,8], index: 1, kind: input, shape index: {}]   ;;  %s1920_s2 = inlined_call_operand.vmem [shape: f32[8,1], index: 2, kind: input, shape index: {}]   ;;  %s1921_s3 = inlined_call_operand.vmem [shape: bf16[8,200], index: 3, kind: input, shape index: {}]   ;;  %s1922_s4 = inlined_call_operand.vmem [shape: f32[8,1], index: 4, kind: input, shape index: {}]   ;;  %s1923_s5 = inlined_call_operand.hbm [shape: f32[25,1,256], index: 5, kind: input, shape index: {}]   ;;  %s1924_s6 = inlined_call_operand.hbm [shape: f32[2,8,256], index: 6, kind: output, shape index: {}]  }
   0x1   :  { %13 = vsyncpa [#allocation3 + $0x1], 0 }
   0x2   :  { %14 = vsyncpa [#allocation6], 0 }
   0x3   :  { %15 = vsyncpa [#allocation4], 0 }
   0x4   :  { %17 = vsyncpa [#allocation4 + $0x1], 0  ;;  %s1372_s21 = smov 0   ;;  %s1374_s22 = smov 0  }
   0x5   :  { %s1376_s23 = smov 0   ;;  %s1378_s24 = smov 0  }
   0x6 LB: > { %s1393_s25 = sadd.s32 4294967295, %s1305_s24   ;;  %s1065_s26 = sadd.s32 4294967294, %s1305_s24   ;;  %s1305_s24 = sphi %s1378_s24, %s1944_s24   ;;  %s1301_s23 = sphi %s1376_s23, %s1943_s23   ;;  %s1297_s22 = sphi %s1374_s22, %s1942_s22   ;;  %s1293_s21 = sphi %s1372_s21, %s1941_s21  }
   0x7   : > { %p43_p0 = scmp.ne.s32.totalorder %s1297_s22, %s1293_s21  ;;  %p1925_p1 = scmp.eq.s32.totalorder %s1393_s25, 0 }
   0x8   : > { %p178_p3 = scmp.eq.s32.totalorder %s1065_s26, 1  ;;  %p1066_p5 = scmp.ge.s32.totalorder %s1305_s24, 1 }
   0x9   : > { %p1402_p4 = por %p1925_p1, %p43_p0  ;;  %p185_p7 = scmp.lt.s32.totalorder %s1305_s24, 3 }
   0xa   : > { %p1407_p6 = por %p178_p3, %p43_p0  ;;  %s1307_s30 = smov [#allocation5]  }
   0xb   : > { %s1928_s27 = scalar_select %p1402_p4, 1, 0 }
   0xc   : > { %s1929_s28 = scalar_select %p1407_p6, 1, 0 }
   0xd   : > { %p1412_p8 = pnand %p1066_p5, %p185_p7  ;;  %s209_s7 = sshll.u32 %s1307_s30, 4  ;;  %s1416_s7 = int_to_ptr.vmem [resolvable:$true] %s209_s7 }
   0xe   : > { %s1428_s9 = sadd.s32 1, %s1305_s24   ;;  %s30_s10 = sadd.s32 1, %s1301_s23 }
   0xf   : > { %s1930_s29 = scalar_select %p1412_p8, 1, 0 }
  0x10   : > { %p1097_p9 = pneg %p1412_p8  ;;  %s27_s11 = ssub.s32 %s1305_s24, %s1428_s9 }
  0x11   : > { %s1177_s14 = scalar_lea.hbm %s1923_s5, 800 }
  0x12   : > { %p1423_p11 = pnand %p1097_p9, %p1925_p1  ;;  %p1178_p12 = scmp.ne.s32.totalorder %s1923_s5, %s1177_s14 }
  0x13   : > { %p1184_p5 = scmp.lt.u32.totalorder %s1177_s14, %s1923_s5 }
  0x14   : > { %p1179_p13 = pneg %p1423_p11 }
  0x16   : > { %p1180_p0 = pnand %p1179_p13, %p1178_p12 }
  0x18   : > { %p1181_p3 = pneg %p1180_p0 }
  0x1a   : > { %p1186_p7 = pnand %p1184_p5, %p1181_p3 }
  0x1c   : > { %1189 = shalt.err (!%p1186_p7)
}
  0x1d   : > { %s1190_s19 = scalar_lea.vmem %s1416_s7, 800  ;;  %p1198_p2 = scmp.lt.s32.totalorder %s1416_s7, %s1416_s7 }
  0x1e   : > { %p1191_p9 = scmp.ne.s32.totalorder %s1416_s7, %s1190_s19  ;;  %p1199_p6 = scmp.lt.s32.totalorder %s1190_s19, %s1190_s19 }
  0x20   : > { %p1193_p10 = pnand %p1191_p9, %p1179_p13  ;;  %p1200_p4 = por %p1199_p6, %p1198_p2 }
  0x22   : > { %p1194_p1 = pneg %p1193_p10 }
  0x24   : > { %p1201_p8 = pnand %p1200_p4, %p1194_p1 }
  0x26   : > { %1204 = shalt.err (!%p1201_p8)
}
  0x27   : > { %s1308_s20 = smov 32   ;;  %s1309_s26 = smov 2  }
  0x28   : > { %1100 = dma.hbm_to_vmem [thread:$0]  (!%p1423_p11), %s1923_s5, 800, %s1416_s7, [#allocation6], %s1308_s20, %s1308_s20, %s1309_s26  }
  0x29   : > { %p28_p2 = scmp.eq.s32.totalorder %s27_s11, 0  ;;  %p37_p1 = scmp.ne.s32.totalorder %s1301_s23, %s1297_s22 }
  0x2a   : > { %p38_p4 = scmp.eq.s32.totalorder %s1305_s24, 0  ;;  %p1110_p6 = scmp.lt.s32.totalorder %s1305_s24, 2 }
  0x2b   : > { %s1459_s13 = scalar_select %p28_p2, %s1301_s23, %s30_s10  }
  0x2c   : > { %p39_p8 = por %p38_p4, %p37_p1  ;;  %p1932_p10 = scmp.eq.s32.totalorder %s1393_s25, 1 }
  0x2d   : > { %s223_s15 = sand.u32 1, %s1301_s23   ;;  %s1087_s16 = sshll.u32 %s1305_s24, 8 }
  0x2e   : > { %p1463_p12 = por %p1932_p10, %p37_p1  ;;  %s1069_s17 = sshll.u32 %s223_s15, 4 }
  0x2f   : > { %s1472_s19 = scalar_lea.hbm %s1918_s0, %s1087_s16  ;;  %s227_s7 = scalar_lea.vmem [#allocation2], %s1069_s17 }
  0x30   : > { %s235_s10 = sshll.u32 %s227_s7, 4  ;;  %p1474_p11 = pnand %p1110_p6, %p39_p8  ;;  %s1478_s10 = int_to_ptr.vmem [resolvable:$true] %s235_s10 }
  0x31   : > { %s224_s20 = scalar_lea.sflag [#allocation3], %s223_s15  ;;  %s1205_s26 = scalar_lea.hbm %s1472_s19, 256 }
  0x32   : > { %p1206_p13 = scmp.ne.s32.totalorder %s1472_s19, %s1205_s26  ;;  %p1207_p0 = pneg %p1474_p11 }
  0x33   : > { %s1210_s16 = scalar_lea.hbm %s1918_s0, 512  ;;  %p1211_p7 = scmp.lt.u32.totalorder %s1472_s19, %s1918_s0 }
  0x34   : > { %p1208_p3 = pnand %p1207_p0, %p1206_p13  ;;  %p1212_p9 = scmp.lt.u32.totalorder %s1210_s16, %s1205_s26 }
  0x35   : > { %p1214_p1 = scmp.lt.u32.totalorder %s1205_s26, %s1472_s19 }
  0x36   : > { %p1209_p5 = pneg %p1208_p3  ;;  %p1213_p2 = por %p1212_p9, %p1211_p7 }
  0x38   : > { %p1215_p4 = por %p1214_p1, %p1213_p2 }
  0x3a   : > { %p1216_p6 = pnand %p1215_p4, %p1209_p5 }
  0x3c   : > { %1219 = shalt.err (!%p1216_p6)
}
  0x3d   : > { %s1220_s15 = scalar_lea.vmem %s1478_s10, 256  ;;  %s1310_s18 = smov [#allocation2]  }
  0x3e   : > { %p1221_p8 = scmp.ne.s32.totalorder %s1478_s10, %s1220_s15  ;;  %s1225_s7 = sshll.u32 %s1310_s18, 4  ;;  %s1226_s7 = int_to_ptr.vmem [resolvable:$false] %s1225_s7 }
  0x3f   : > { %s1227_s30 = scalar_lea.vmem %s1226_s7, 512  ;;  %p1228_p3 = scmp.lt.s32.totalorder %s1478_s10, %s1226_s7 }
  0x40   : > { %p1223_p10 = pnand %p1221_p8, %p1207_p0  ;;  %p1229_p7 = scmp.lt.s32.totalorder %s1227_s30, %s1220_s15 }
  0x42   : > { %p1224_p13 = pneg %p1223_p10  ;;  %p1230_p9 = por %p1229_p7, %p1228_p3 }
  0x44   : > { %p1231_p2 = pnand %p1230_p9, %p1224_p13 }
  0x46   : > { %1234 = shalt.err (!%p1231_p2)
}
  0x47   : > { %1104 = dma.hbm_to_vmem [thread:$0]  (!%p1474_p11), %s1472_s19, 256, %s1478_s10, %s224_s20  }
  0x48   : > { %p1935_p5 = scmp.ne.s32.totalorder %s1930_s29, 0 }
  0x49   : > { %s1508_s26 = sand.u32 (!%p1935_p5), 1, %s1297_s22   ;;  %p1936_p0 = scmp.ne.s32.totalorder (!%p1935_p5), %s1928_s27, 0 }
  0x4a   : > { %244 = sbr.rel (%p1935_p5) target bundleno = 753 (0x2f1), region = 44  ;;  %s1073_s12 = sshll.u32 (!%p1935_p5), %s1508_s26, 4 }
  0x4b   : > { %s247_s16 = scalar_lea.sflag (!%p1935_p5), [#allocation3], %s1508_s26  ;;  %s250_s17 = scalar_lea.vmem (!%p1935_p5), [#allocation2], %s1073_s12 }
  0x51   : > { %1280 = dma.done.wait (%p1936_p0), %s247_s16, 256  }
  0x52   : > { %1282 = vsyncadd (%p1936_p0), %s247_s16, 4294967040  ;;  %p1937_p11 = scmp.eq.s32.totalorder %s1393_s25, 0 }
  0x54   : > { %1284 = dma.done.wait (%p1937_p11), [#allocation6], 800   ;;  %p1938_p1 = pmov %p1937_p11 }
  0x55   : > { %v1311_v0 = vmov 0   ;;  %v1522_v1 = vld [vmem:[%s250_s17 + $0x8] sm:$0xff]  ;;  %vm299_vm0 = vcmask 1043456   ;;  %v1524_v2 = vld [vmem:[%s250_s17] sm:$0xff]  ;;  %vm295_vm1 = vcmask 64512   ;;  %s1312_s11 = smov 33   ;;  %v351_v32 = vlaneseq }
  0x56   : > { %1286 = vsyncadd (%p1938_p1), [#allocation6], 4294966496  ;;  %338 = vmatprep.mubr.bf16.mxu0 %v1311_v0  ;;  %1173 = vset.pattern.permute.xlu0 %v1311_v0  ;;  %v288_v3 = vpack.c.bf16 %v1522_v1, %v1522_v1  ;;  %v287_v4 = vpack.c.bf16 %v1524_v2, %v1524_v2  ;;  %v289_v5 = vld [vmem:[%s1920_s2] sm:$0xff]  ;;  %s1313_s20 = smov 34   ;;  %s1314_s8 = smov 32   ;;  %vm915_vm2 = vcmask 588800  }
  0x57   : > { %1174 = vset.pattern.permute.xlu1 %v1311_v0  ;;  %292 = vperm.xlu0 %1173, %v289_v5   ;;  %v286_v7 = vld [vmem:[%s1919_s1] sm:$0xf]  ;;  %s1315_s15 = smov 31   ;;  %s1316_s18 = smov 30   ;;  %v359_v35 = vshrl.u32 %v351_v32, 7  ;;  %v1626_v38 = vand.u32 127, %v351_v32 }
  0x58   : > { %1076 = vmatprep.subr.msk.bf16.mxu0 %vm299_vm0, %v288_v3  ;;  %v301_v6 = vsel %vm299_vm0, %v287_v4, 0  ;;  %s1317_s7 = smov 18   ;;  %s1318_s30 = smov 17   ;;  %v1591_v15 = vld [vmem:[%s1921_s3] sm:$0xff]  ;;  %v466_v52 = vld [vmem:[#allocation5 + $0xa] sm:$0x3] }
  0x59   : > { %307 = vmatpush1.bf16.msra.mxu0 %v301_v6  ;;  %s1319_s16 = smov 16   ;;  %s1320_s17 = smov 15   ;;  %v1079_v16 = vcombine.high %v1591_v15, %v1591_v15  ;;  %v903_v17 = vld [vmem:[%s1922_s4] sm:$0xff]  ;;  %v1628_v39 = vsub.s32 0, %v359_v35  ;;  %v1634_v43 = vsub.s32 1, %v359_v35  ;;  %vm374_vm3 = vcmp.lt.s32.totalorder %v1626_v38, 33 }
  0x5a   : > { %s1321_s27 = smov 14   ;;  %s1322_s29 = smov 2   ;;  %v378_v42 = vld [vmem:[#allocation5 + $0x2] sm:$0x3]  ;;  %v422_v44 = vld [vmem:[#allocation5 + $0x6] sm:$0x3] }
  0x5b   : > { %s1323_s19 = smov 1   ;;  %s1324_s10 = smov 127   ;;  %1081 = vmatprep.mubr.msk.bf16.mxu1 %vm915_vm2, %v1079_v16  ;;  %v356_v45 = vld [vmem:[#allocation5] sm:$0x3]  ;;  %v383_v46 = vrot.slane %v378_v42, %v1628_v39  ;;  %v400_v47 = vld [vmem:[#allocation5 + $0x4] sm:$0x3]  ;;  %v431_v51 = vrot.slane %v422_v44, %v1634_v43  ;;  %v387_v53 = vrot.slane %v378_v42, %v1634_v43  ;;  %v427_v58 = vrot.slane %v422_v44, %v1628_v39 }
  0x5c   : > { %1077 = vmatmul.mubr.msk.bf16.vlgmr.msra.gmra.mrb[0].mxu0 %vm295_vm1, %v286_v7  ;;  %vm418_vm4 = vcmp.lt.s32.totalorder %v1626_v38, 31  ;;  %vm396_vm5 = vcmp.lt.s32.totalorder %v1626_v38, 32  ;;  %vm353_vm6 = vcmp.lt.s32.totalorder %v1626_v38, 34  ;;  %v361_v55 = vrot.slane %v356_v45, %v1628_v39  ;;  %v444_v61 = vld [vmem:[#allocation5 + $0x8] sm:$0x3] }
  0x5d   : > { %v365_v56 = vrot.slane %v356_v45, %v1634_v43  ;;  %v409_v57 = vrot.slane %v400_v47, %v1634_v43  ;;  %vm440_vm7 = vcmp.lt.s32.totalorder %v1626_v38, 30  ;;  %vm462_vm8 = vcmp.lt.s32.totalorder %v1626_v38, 18 }
  0x5e   : > { %v475_v62 = vrot.slane %v466_v52, %v1634_v43  ;;  %vm506_vm9 = vcmp.lt.s32.totalorder %v1626_v38, 16  ;;  %v471_v45 = vrot.slane %v466_v52, %v1628_v39  ;;  %vm484_vm10 = vcmp.lt.s32.totalorder %v1626_v38, 17 }
  0x5f   : > { %vm550_vm11 = vcmp.lt.s32.totalorder %v1626_v38, 14  ;;  %vm528_vm12 = vcmp.lt.s32.totalorder %v1626_v38, 15  ;;  %vm594_vm13 = vcmp.lt.s32.totalorder %v1626_v38, 1  ;;  %vm572_vm14 = vcmp.lt.s32.totalorder %v1626_v38, 2 }
  0x60   : > { %vm616_vm15 = vcmp.lt.s32.totalorder %v1626_v38, 127  ;;  %vm660_vm1 = vcmp.lt.s32.totalorder %v1626_v38, 114  ;;  %vm638_vm2 = vcmp.lt.s32.totalorder %v1626_v38, 126 }
  0xd6   : > { %v293_v8 = vpop.permute.xlu0 %292 }
 0x12f   : > { %v340_v9 = vpop.f32.mrb[0].mxu0 }
 0x130   : > { %v1538_v10 = vadd.f32 %v340_v9, %v293_v8  ;;  %v342_v11 = vpop.f32.mrb[1].mxu0 }
 0x131   : > { %v344_v12 = vpop.f32.mrb[2].mxu0  ;;  %v1543_v14 = vadd.f32 %v342_v11, %v293_v8 }
 0x132   : > { %v345_v13 = vpop.f32.mrb[3].mxu0  ;;  %370 = vrot.lane.b32.xlu1 %v1538_v10, %s1312_s11  ;;  %347 = vrot.lane.b32.xlu0 %v1538_v10, %s1313_s20  ;;  %v405_v12 = vrot.slane %v400_v47, %v1628_v39 }
 0x133   : > { %v453_v13 = vrot.slane %v444_v61, %v1634_v43 }
 0x136   : > { %392 = vrot.lane.b32.xlu1 %v1538_v10, %s1314_s8  ;;  %372 = vrot.lane.b32.xlu0 %v1543_v14, %s1312_s11  ;;  %s1325_s11 = smov 126  }
 0x13a   : > { %414 = vrot.lane.b32.xlu1 %v1538_v10, %s1315_s15  ;;  %394 = vrot.lane.b32.xlu0 %v1543_v14, %s1314_s8  ;;  %s1326_s8 = smov 114  }
 0x13e   : > { %436 = vrot.lane.b32.xlu1 %v1538_v10, %s1316_s18  ;;  %416 = vrot.lane.b32.xlu0 %v1543_v14, %s1315_s15  ;;  %s1327_s15 = smov 113  }
 0x142   : > { %458 = vrot.lane.b32.xlu1 %v1538_v10, %s1317_s7  ;;  %438 = vrot.lane.b32.xlu0 %v1543_v14, %s1316_s18  ;;  %s1329_s18 = smov 111  }
 0x146   : > { %480 = vrot.lane.b32.xlu1 %v1538_v10, %s1318_s30  ;;  %460 = vrot.lane.b32.xlu0 %v1543_v14, %s1317_s7  ;;  %s1330_s7 = smov 110  }
 0x14a   : > { %502 = vrot.lane.b32.xlu1 %v1538_v10, %s1319_s16  ;;  %482 = vrot.lane.b32.xlu0 %v1543_v14, %s1318_s30  ;;  %s1331_s30 = smov 98  }
 0x14e   : > { %524 = vrot.lane.b32.xlu1 %v1538_v10, %s1320_s17  ;;  %504 = vrot.lane.b32.xlu0 %v1543_v14, %s1319_s16  ;;  %s1332_s16 = smov 97  }
 0x152   : > { %546 = vrot.lane.b32.xlu1 %v1538_v10, %s1321_s27  ;;  %526 = vrot.lane.b32.xlu0 %v1543_v14, %s1320_s17  ;;  %s1333_s17 = smov 96  }
 0x156   : > { %568 = vrot.lane.b32.xlu1 %v1538_v10, %s1322_s29  ;;  %548 = vrot.lane.b32.xlu0 %v1543_v14, %s1321_s27 }
 0x15a   : > { %590 = vrot.lane.b32.xlu1 %v1538_v10, %s1323_s19  ;;  %570 = vrot.lane.b32.xlu0 %v1543_v14, %s1322_s29 }
 0x15e   : > { %349 = vrot.lane.b32.xlu1 %v1543_v14, %s1313_s20  ;;  %592 = vrot.lane.b32.xlu0 %v1543_v14, %s1323_s19  ;;  %s1328_s20 = smov 112   ;;  %s1334_s19 = smov 95  }
 0x162   : > { %612 = vrot.lane.b32.xlu1 %v1538_v10, %s1324_s10  ;;  %614 = vrot.lane.b32.xlu0 %v1543_v14, %s1324_s10  ;;  %s1335_s10 = smov 94  }
 0x166   : > { %634 = vrot.lane.b32.xlu1 %v1538_v10, %s1325_s11  ;;  %636 = vrot.lane.b32.xlu0 %v1543_v14, %s1325_s11 }
 0x16a   : > { %656 = vrot.lane.b32.xlu1 %v1538_v10, %s1326_s8  ;;  %658 = vrot.lane.b32.xlu0 %v1543_v14, %s1326_s8 }
 0x16e   : > { %678 = vrot.lane.b32.xlu1 %v1538_v10, %s1327_s15  ;;  %680 = vrot.lane.b32.xlu0 %v1543_v14, %s1327_s15  ;;  %s1088_s15 = sshll.u32 %s1393_s25, 8  ;;  %s971_s25 = scalar_lea.sflag [#allocation4], %s1508_s26 }
 0x172   : > { %700 = vrot.lane.b32.xlu1 %v1538_v10, %s1328_s20  ;;  %702 = vrot.lane.b32.xlu0 %v1543_v14, %s1328_s20  ;;  %s282_s20 = scalar_lea.vmem [#allocation7], %s1073_s12 }
 0x176   : > { %722 = vrot.lane.b32.xlu1 %v1538_v10, %s1329_s18  ;;  %724 = vrot.lane.b32.xlu0 %v1543_v14, %s1329_s18  ;;  %s985_s18 = sshll.u32 %s282_s20, 4  ;;  %s1876_s18 = int_to_ptr.vmem [resolvable:$true] %s985_s18 }
 0x177   : > { %s1235_s12 = scalar_lea.vmem %s1876_s18, 256 }
 0x178   : > { %p1236_p4 = scmp.ne.s32.totalorder %s1876_s18, %s1235_s12 }
 0x17a   : > { %744 = vrot.lane.b32.xlu1 %v1538_v10, %s1330_s7  ;;  %746 = vrot.lane.b32.xlu0 %v1543_v14, %s1330_s7  ;;  %p1237_p6 = pnand %p1236_p4, %p1463_p12 }
 0x17c   : > { %p1238_p8 = pneg %p1237_p6 }
 0x17e   : > { %766 = vrot.lane.b32.xlu1 %v1538_v10, %s1331_s30  ;;  %768 = vrot.lane.b32.xlu0 %v1543_v14, %s1331_s30 }
 0x182   : > { %788 = vrot.lane.b32.xlu1 %v1538_v10, %s1332_s16  ;;  %790 = vrot.lane.b32.xlu0 %v1543_v14, %s1332_s16  ;;  %s1874_s16 = scalar_lea.hbm %s1924_s6, %s1088_s15 }
 0x186   : > { %810 = vrot.lane.b32.xlu1 %v1538_v10, %s1333_s17  ;;  %812 = vrot.lane.b32.xlu0 %v1543_v14, %s1333_s17  ;;  %s1336_s17 = smov [#allocation7]  }
 0x187   : > { %s1239_s27 = sshll.u32 %s1336_s17, 4  ;;  %s1240_s27 = int_to_ptr.vmem [resolvable:$false] %s1239_s27 }
 0x188   : > { %s1241_s29 = scalar_lea.vmem %s1240_s27, 512  ;;  %p1242_p10 = scmp.lt.s32.totalorder %s1876_s18, %s1240_s27 }
 0x189   : > { %p1243_p13 = scmp.lt.s32.totalorder %s1241_s29, %s1235_s12 }
 0x18a   : > { %832 = vrot.lane.b32.xlu1 %v1538_v10, %s1334_s19  ;;  %834 = vrot.lane.b32.xlu0 %v1543_v14, %s1334_s19 }
 0x18b   : > { %p1244_p3 = por %p1243_p13, %p1242_p10 }
 0x18d   : > { %p1245_p7 = pnand %p1244_p3, %p1238_p8 }
 0x18e   : > { %854 = vrot.lane.b32.xlu1 %v1538_v10, %s1335_s10  ;;  %856 = vrot.lane.b32.xlu0 %v1543_v14, %s1335_s10 }
 0x192   : > { %906 = vperm.xlu1 %1174, %v903_v17   ;;  %v510_v17 = vld [vmem:[#allocation5 + $0xe] sm:$0x3] }
 0x1a4   : > { %v371_v18 = vpop.permute.xlu1 %370  ;;  %v348_v19 = vpop.permute.xlu0 %347 }
 0x1a8   : > { %v1602_v20 = vpop.permute.xlu1 %392  ;;  %v373_v21 = vpop.permute.xlu0 %372 }
 0x1a9   : > { %v376_v50 = vsel %vm374_vm3, %v373_v21, %v371_v18  ;;  %v375_v54 = vsel %vm374_vm3, %v371_v18, %v373_v21  ;;  %v488_v21 = vld [vmem:[#allocation5 + $0xc] sm:$0x3]  ;;  %vm704_vm3 = vcmp.lt.s32.totalorder %v1626_v38, 112 }
 0x1aa   : > { %v390_v60 = vmul.f32 %v383_v46, %v376_v50  ;;  %v391_v6 = vmul.f32 %v387_v53, %v375_v54  ;;  %v519_v46 = vrot.slane %v510_v17, %v1634_v43  ;;  %v497_v53 = vrot.slane %v488_v21, %v1634_v43  ;;  %v554_v54 = vld [vmem:[#allocation5 + $0x12] sm:$0x3] }
 0x1ac   : > { %v415_v22 = vpop.permute.xlu1 %414  ;;  %v395_v23 = vpop.permute.xlu0 %394 }
 0x1ad   : > { %v397_v3 = vsel %vm396_vm5, %v1602_v20, %v395_v23  ;;  %v398_v18 = vsel %vm396_vm5, %v395_v23, %v1602_v20  ;;  %vm748_vm5 = vcmp.lt.s32.totalorder %v1626_v38, 110 }
 0x1ae   : > { %v412_v50 = vmul.f32 %v405_v12, %v398_v18 }
 0x1b0   : > { %v1604_v24 = vpop.permute.xlu1 %436  ;;  %v417_v25 = vpop.permute.xlu0 %416 }
 0x1b1   : > { %v419_v59 = vsel %vm418_vm4, %v415_v22, %v417_v25  ;;  %v420_v7 = vsel %vm418_vm4, %v417_v25, %v415_v22  ;;  %vm682_vm4 = vcmp.lt.s32.totalorder %v1626_v38, 113 }
 0x1b2   : > { %v435_v8 = vmul.f32 %v431_v51, %v419_v59  ;;  %v434_v42 = vmul.f32 %v427_v58, %v420_v7  ;;  %v449_v51 = vrot.slane %v444_v61, %v1628_v39  ;;  %v598_v7 = vld [vmem:[#allocation5 + $0x16] sm:$0x3] }
 0x1b3   : > { %v607_v18 = vrot.slane %v598_v7, %v1634_v43 }
 0x1b4   : > { %v1606_v26 = vpop.permute.xlu1 %458  ;;  %v1608_v27 = vpop.permute.xlu0 %438 }
 0x1b5   : > { %v441_v44 = vsel %vm440_vm7, %v1604_v24, %v1608_v27 }
 0x1b8   : > { %v1610_v28 = vpop.permute.xlu1 %480  ;;  %v1612_v29 = vpop.permute.xlu0 %460 }
 0x1b9   : > { %v463_v16 = vsel %vm462_vm8, %v1606_v26, %v1612_v29  ;;  %v464_v20 = vsel %vm462_vm8, %v1612_v29, %v1606_v26  ;;  %v442_v26 = vsel %vm440_vm7, %v1608_v27, %v1604_v24  ;;  %v457_v29 = vmul.f32 %v453_v13, %v441_v44 }
 0x1ba   : > { %v479_v23 = vmul.f32 %v475_v62, %v463_v16  ;;  %v478_v59 = vmul.f32 %v471_v45, %v464_v20  ;;  %v878_v24 = vpack.c.bf16 %v434_v42, %v412_v50  ;;  %v563_v62 = vrot.slane %v554_v54, %v1634_v43  ;;  %v576_v16 = vld [vmem:[#allocation5 + $0x14] sm:$0x3]  ;;  %v620_v42 = vld [vmem:[#allocation5 + $0x1a] sm:$0x3] }
 0x1bb   : > { %vm770_vm7 = vcmp.lt.s32.totalorder %v1626_v38, 98  ;;  %vm792_vm8 = vcmp.lt.s32.totalorder %v1626_v38, 97 }
 0x1bc   : > { %v1614_v30 = vpop.permute.xlu1 %502  ;;  %v1616_v31 = vpop.permute.xlu0 %482 }
 0x1c0   : > { %v1618_v33 = vpop.permute.xlu1 %524  ;;  %v1620_v34 = vpop.permute.xlu0 %504 }
 0x1c1   : > { %v507_v52 = vsel %vm506_vm9, %v1614_v30, %v1620_v34  ;;  %v508_v27 = vsel %vm506_vm9, %v1620_v34, %v1614_v30  ;;  %v486_v30 = vsel %vm484_vm10, %v1616_v31, %v1610_v28  ;;  %vm814_vm9 = vcmp.lt.s32.totalorder %v1626_v38, 96 }
 0x1c2   : > { %v523_v61 = vmul.f32 %v519_v46, %v507_v52 }
 0x1c4   : > { %v1622_v36 = vpop.permute.xlu1 %546  ;;  %v1624_v37 = vpop.permute.xlu0 %526 }
 0x1c5   : > { %v529_v13 = vsel %vm528_vm12, %v1618_v33, %v1624_v37  ;;  %v530_v44 = vsel %vm528_vm12, %v1624_v37, %v1618_v33 }
 0x1c8   : > { %v1630_v40 = vpop.permute.xlu1 %568  ;;  %v1632_v41 = vpop.permute.xlu0 %548 }
 0x1cc   : > { %v1639_v48 = vpop.permute.xlu1 %590  ;;  %v1641_v49 = vpop.permute.xlu0 %570 }
 0x1cd   : > { %v573_v46 = vsel %vm572_vm14, %v1630_v40, %v1641_v49 }
 0x1d0   : > { %v350_v63 = vpop.permute.xlu1 %349  ;;  %v1656_v0 = vpop.permute.xlu0 %592 }
 0x1d1   : > { %v354_v4 = vsel %vm353_vm6, %v348_v19, %v350_v63  ;;  %v355_v5 = vsel %vm353_vm6, %v350_v63, %v348_v19  ;;  %v413_v19 = vmul.f32 %v409_v57, %v397_v3  ;;  %v881_v63 = vpack.c.bf16 %v479_v23, %v457_v29  ;;  %v664_v29 = vld [vmem:[#allocation5 + $0x1e] sm:$0x3] }
 0x1d2   : > { %v368_v9 = vmul.f32 %v361_v55, %v355_v5  ;;  %v369_v11 = vmul.f32 %v365_v56, %v354_v4  ;;  %v515_v55 = vrot.slane %v510_v17, %v1628_v39  ;;  %v532_v56 = vld [vmem:[#allocation5 + $0x10] sm:$0x3]  ;;  %v456_v3 = vmul.f32 %v449_v51, %v442_v26 }
 0x1d3   : > { %v879_v47 = vpack.c.bf16 %v435_v8, %v413_v19  ;;  %v493_v4 = vrot.slane %v488_v21, %v1628_v39  ;;  %v541_v5 = vrot.slane %v532_v56, %v1634_v43  ;;  %v559_v8 = vrot.slane %v554_v54, %v1628_v39 }
 0x1d4   : > { %v1673_v22 = vpop.permute.xlu1 %612  ;;  %v1675_v25 = vpop.permute.xlu0 %614  ;;  %v877_v32 = vpack.c.bf16 %v391_v6, %v369_v11  ;;  %v876_v35 = vpack.c.bf16 %v390_v60, %v368_v9  ;;  %v485_v60 = vsel %vm484_vm10, %v1610_v28, %v1616_v31  ;;  %v551_v6 = vsel %vm550_vm11, %v1622_v36, %v1632_v41 }
 0x1d5   : > { %v501_v34 = vmul.f32 %v497_v53, %v485_v60  ;;  %v522_v12 = vmul.f32 %v515_v55, %v508_v27  ;;  %v880_v28 = vpack.c.bf16 %v478_v59, %v456_v3  ;;  %v552_v31 = vsel %vm550_vm11, %v1632_v41, %v1622_v36 }
 0x1d6   : > { %925 = vmatprep.subr.bf16.mxu1 %v877_v32  ;;  %v567_v17 = vmul.f32 %v563_v62, %v551_v6  ;;  %v500_v21 = vmul.f32 %v493_v4, %v486_v30  ;;  %v537_v32 = vrot.slane %v532_v56, %v1628_v39  ;;  %v545_v36 = vmul.f32 %v541_v5, %v529_v13  ;;  %v708_v4 = vld [vmem:[#allocation5 + $0x22] sm:$0x3] }
 0x1d7   : > { %926 = vmatpush1.bf16.msra.mxu1 %v876_v35  ;;  %v883_v19 = vpack.c.bf16 %v523_v61, %v501_v34  ;;  %v595_v35 = vsel %vm594_vm13, %v1639_v48, %v1656_v0  ;;  %v585_v41 = vrot.slane %v576_v16, %v1634_v43  ;;  %v566_v23 = vmul.f32 %v559_v8, %v552_v31 }
 0x1d8   : > { %v1700_v57 = vpop.permute.xlu1 %634  ;;  %927 = vmatprep.subr.bf16.mxu1 %v879_v47  ;;  %v1702_v58 = vpop.permute.xlu0 %636  ;;  %v603_v47 = vrot.slane %v598_v7, %v1628_v39  ;;  %v882_v50 = vpack.c.bf16 %v522_v12, %v500_v21  ;;  %v596_v33 = vsel %vm594_vm13, %v1656_v0, %v1639_v48  ;;  %v611_v37 = vmul.f32 %v607_v18, %v595_v35  ;;  %v686_v7 = vld [vmem:[#allocation5 + $0x20] sm:$0x3] }
 0x1d9   : > { %v629_v51 = vrot.slane %v620_v42, %v1634_v43  ;;  %v885_v53 = vpack.c.bf16 %v567_v17, %v545_v36  ;;  %v544_v52 = vmul.f32 %v537_v32, %v530_v44  ;;  %v581_v54 = vrot.slane %v576_v16, %v1628_v39  ;;  %v730_v32 = vld [vmem:[#allocation5 + $0x24] sm:$0x3] }
 0x1da   : > { %v618_v26 = vsel %vm616_vm15, %v1675_v25, %v1673_v22  ;;  %v574_v55 = vsel %vm572_vm14, %v1641_v49, %v1630_v40  ;;  %v589_v48 = vmul.f32 %v585_v41, %v573_v46  ;;  %v610_v59 = vmul.f32 %v603_v47, %v596_v33 }
 0x1db   : > { %928 = vmatpush1.bf16.msra.mxu1 %v878_v24  ;;  %v625_v60 = vrot.slane %v620_v42, %v1628_v39  ;;  %v642_v24 = vld [vmem:[#allocation5 + $0x1c] sm:$0x3]  ;;  %v884_v27 = vpack.c.bf16 %v566_v23, %v544_v52  ;;  %v617_v61 = vsel %vm616_vm15, %v1673_v22, %v1675_v25  ;;  %v633_v62 = vmul.f32 %v629_v51, %v618_v26 }
 0x1dc   : > { %v1726_v9 = vpop.permute.xlu1 %656  ;;  %929 = vmatprep.subr.bf16.mxu1 %v881_v63  ;;  %v1728_v11 = vpop.permute.xlu0 %658  ;;  %v673_v40 = vrot.slane %v664_v29, %v1634_v43  ;;  %v887_v49 = vpack.c.bf16 %v611_v37, %v589_v48  ;;  %v588_v63 = vmul.f32 %v581_v54, %v574_v55  ;;  %v651_v5 = vrot.slane %v642_v24, %v1634_v43  ;;  %v796_v37 = vld [vmem:[#allocation5 + $0x2a] sm:$0x3]  ;;  %v774_v55 = vld [vmem:[#allocation5 + $0x28] sm:$0x3] }
 0x1dd   : > { %v662_v3 = vsel %vm660_vm1, %v1728_v11, %v1726_v9  ;;  %v669_v6 = vrot.slane %v664_v29, %v1628_v39  ;;  %v632_v30 = vmul.f32 %v625_v60, %v617_v61  ;;  %v640_v34 = vsel %vm638_vm2, %v1702_v58, %v1700_v57 }
 0x1de   : > { %v886_v8 = vpack.c.bf16 %v610_v59, %v588_v63  ;;  %v661_v12 = vsel %vm660_vm1, %v1726_v9, %v1728_v11  ;;  %v677_v13 = vmul.f32 %v673_v40, %v662_v3  ;;  %v717_v16 = vrot.slane %v708_v4, %v1634_v43 }
 0x1df   : > { %930 = vmatpush1.bf16.msra.mxu1 %v880_v28  ;;  %v889_v28 = vpack.c.bf16 %v633_v62, %v1543_v14  ;;  %v647_v31 = vrot.slane %v642_v24, %v1628_v39  ;;  %v695_v17 = vrot.slane %v686_v7, %v1634_v43  ;;  %v639_v21 = vsel %vm638_vm2, %v1700_v57, %v1702_v58 }
 0x1e0   : > { %v1751_v45 = vpop.permute.xlu1 %678  ;;  %931 = vmatprep.subr.bf16.mxu1 %v883_v19  ;;  %v1753_v20 = vpop.permute.xlu0 %680  ;;  %v752_v19 = vld [vmem:[#allocation5 + $0x26] sm:$0x3]  ;;  %v655_v9 = vmul.f32 %v651_v5, %v640_v34  ;;  %v713_v11 = vrot.slane %v708_v4, %v1628_v39  ;;  %v676_v42 = vmul.f32 %v669_v6, %v661_v12  ;;  %vm726_vm6 = vcmp.lt.s32.totalorder %v1626_v38, 111 }
 0x1e1   : > { %v684_v44 = vsel %vm682_vm4, %v1753_v20, %v1751_v45  ;;  %v888_v36 = vpack.c.bf16 %v632_v30, %v1538_v10  ;;  %v761_v41 = vrot.slane %v752_v19, %v1634_v43  ;;  %v654_v46 = vmul.f32 %v647_v31, %v639_v21  ;;  %v862_v21 = vld [vmem:[#allocation5 + $0x30] sm:$0x3] }
 0x1e2   : > { %v891_v23 = vpack.c.bf16 %v677_v13, %v655_v9  ;;  %v691_v47 = vrot.slane %v686_v7, %v1628_v39  ;;  %v683_v10 = vsel %vm682_vm4, %v1751_v45, %v1753_v20  ;;  %v699_v51 = vmul.f32 %v695_v17, %v684_v44 }
 0x1e3   : > { %932 = vmatpush1.bf16.msra.mxu1 %v882_v50  ;;  %v739_v50 = vrot.slane %v730_v32, %v1634_v43  ;;  %v890_v48 = vpack.c.bf16 %v676_v42, %v654_v46  ;;  %v735_v60 = vrot.slane %v730_v32, %v1628_v39  ;;  %v783_v61 = vrot.slane %v774_v55, %v1634_v43 }
 0x1e4   : > { %v701_v0 = vpop.permute.xlu1 %700  ;;  %933 = vmatprep.subr.bf16.mxu1 %v885_v53  ;;  %v703_v56 = vpop.permute.xlu0 %702  ;;  %v757_v53 = vrot.slane %v752_v19, %v1628_v39  ;;  %v698_v59 = vmul.f32 %v691_v47, %v683_v10  ;;  %v801_v40 = vrot.slane %v796_v37, %v1628_v39  ;;  %v779_v34 = vrot.slane %v774_v55, %v1628_v39 }
 0x1e5   : > { %v706_v18 = vsel %vm704_vm3, %v703_v56, %v701_v0  ;;  %v705_v57 = vsel %vm704_vm3, %v701_v0, %v703_v56  ;;  %v805_v56 = vrot.slane %v796_v37, %v1634_v43  ;;  %vm836_vm10 = vcmp.lt.s32.totalorder %v1626_v38, 95 }
 0x1e6   : > { %v721_v58 = vmul.f32 %v717_v16, %v706_v18  ;;  %v720_v26 = vmul.f32 %v713_v11, %v705_v57  ;;  %vm858_vm11 = vcmp.lt.s32.totalorder %v1626_v38, 94  ;;  %v867_v57 = vrot.slane %v862_v21, %v1628_v39 }
 0x1e7   : > { %934 = vmatpush1.bf16.msra.mxu1 %v884_v27  ;;  %v871_v46 = vrot.slane %v862_v21, %v1634_v43 }
 0x1e8   : > { %v723_v22 = vpop.permute.xlu1 %722  ;;  %935 = vmatprep.subr.bf16.mxu1 %v887_v49  ;;  %v725_v25 = vpop.permute.xlu0 %724  ;;  %v893_v20 = vpack.c.bf16 %v721_v58, %v699_v51  ;;  %v892_v5 = vpack.c.bf16 %v720_v26, %v698_v59 }
 0x1e9   : > { %v728_v29 = vsel %vm726_vm6, %v725_v25, %v723_v22  ;;  %v727_v24 = vsel %vm726_vm6, %v723_v22, %v725_v25  ;;  %v818_v25 = vld [vmem:[#allocation5 + $0x2c] sm:$0x3] }
 0x1ea   : > { %v743_v27 = vmul.f32 %v739_v50, %v728_v29  ;;  %v742_v30 = vmul.f32 %v735_v60, %v727_v24  ;;  %v823_v17 = vrot.slane %v818_v25, %v1628_v39  ;;  %v827_v18 = vrot.slane %v818_v25, %v1634_v43 }
 0x1eb   : > { %936 = vmatpush1.bf16.msra.mxu1 %v886_v8  ;;  %v840_v8 = vld [vmem:[#allocation5 + $0x2e] sm:$0x3] }
 0x1ec   : > { %v745_v35 = vpop.permute.xlu1 %744  ;;  %937 = vmatprep.subr.bf16.mxu1 %v889_v28  ;;  %v747_v14 = vpop.permute.xlu0 %746  ;;  %v845_v11 = vrot.slane %v840_v8, %v1628_v39  ;;  %v849_v32 = vrot.slane %v840_v8, %v1634_v43 }
 0x1ed   : > { %v750_v33 = vsel %vm748_vm5, %v747_v14, %v745_v35  ;;  %v749_v0 = vsel %vm748_vm5, %v745_v35, %v747_v14 }
 0x1ee   : > { %v765_v45 = vmul.f32 %v761_v41, %v750_v33  ;;  %v764_v63 = vmul.f32 %v757_v53, %v749_v0  ;;  %v1078_v0 = vcombine.low %v1591_v15, %v1591_v15 }
 0x1ef   : > { %938 = vmatpush1.bf16.msra.mxu1 %v888_v36 }
 0x1f0   : > { %v767_v52 = vpop.permute.xlu1 %766  ;;  %939 = vmatprep.subr.bf16.mxu1 %v891_v23  ;;  %v769_v54 = vpop.permute.xlu0 %768  ;;  %v895_v22 = vpack.c.bf16 %v765_v45, %v743_v27  ;;  %v894_v19 = vpack.c.bf16 %v764_v63, %v742_v30 }
 0x1f1   : > { %v772_v3 = vsel %vm770_vm7, %v769_v54, %v767_v52  ;;  %v771_v12 = vsel %vm770_vm7, %v767_v52, %v769_v54 }
 0x1f2   : > { %v787_v13 = vmul.f32 %v783_v61, %v772_v3  ;;  %v786_v35 = vmul.f32 %v779_v34, %v771_v12 }
 0x1f3   : > { %940 = vmatpush1.bf16.msra.mxu1 %v890_v48 }
 0x1f4   : > { %v789_v62 = vpop.permute.xlu1 %788  ;;  %941 = vmatprep.subr.bf16.mxu1 %v893_v20  ;;  %v791_v49 = vpop.permute.xlu0 %790 }
 0x1f5   : > { %v794_v4 = vsel %vm792_vm8, %v791_v49, %v789_v62  ;;  %v793_v6 = vsel %vm792_vm8, %v789_v62, %v791_v49 }
 0x1f6   : > { %v809_v7 = vmul.f32 %v805_v56, %v794_v4  ;;  %v808_v31 = vmul.f32 %v801_v40, %v793_v6 }
 0x1f7   : > { %942 = vmatpush1.bf16.msra.mxu1 %v892_v5 }
 0x1f8   : > { %v811_v16 = vpop.permute.xlu1 %810  ;;  %943 = vmatprep.subr.bf16.mxu1 %v895_v22  ;;  %v813_v28 = vpop.permute.xlu0 %812  ;;  %v897_v9 = vpack.c.bf16 %v809_v7, %v787_v13  ;;  %v896_v23 = vpack.c.bf16 %v808_v31, %v786_v35 }
 0x1f9   : > { %v815_v14 = vsel %vm814_vm9, %v811_v16, %v813_v28  ;;  %v816_v42 = vsel %vm814_vm9, %v813_v28, %v811_v16 }
 0x1fa   : > { %v830_v47 = vmul.f32 %v823_v17, %v815_v14  ;;  %v831_v50 = vmul.f32 %v827_v18, %v816_v42 }
 0x1fb   : > { %944 = vmatpush1.bf16.msra.mxu1 %v894_v19 }
 0x1fc   : > { %v833_v44 = vpop.permute.xlu1 %832  ;;  %945 = vmatprep.subr.bf16.mxu1 %v897_v9  ;;  %v835_v36 = vpop.permute.xlu0 %834 }
 0x1fd   : > { %v837_v58 = vsel %vm836_vm10, %v833_v44, %v835_v36  ;;  %v838_v41 = vsel %vm836_vm10, %v835_v36, %v833_v44 }
 0x1fe   : > { %v852_v33 = vmul.f32 %v845_v11, %v837_v58  ;;  %v853_v37 = vmul.f32 %v849_v32, %v838_v41 }
 0x1ff   : > { %946 = vmatpush1.bf16.msra.mxu1 %v896_v23 }
 0x200   : > { %v855_v10 = vpop.permute.xlu1 %854  ;;  %v857_v51 = vpop.permute.xlu0 %856  ;;  %v899_v53 = vpack.c.bf16 %v853_v37, %v831_v50  ;;  %v898_v52 = vpack.c.bf16 %v852_v33, %v830_v47 }
 0x201   : > { %v859_v54 = vsel %vm858_vm11, %v855_v10, %v857_v51  ;;  %v860_v39 = vsel %vm858_vm11, %v857_v51, %v855_v10 }
 0x202   : > { %v874_v26 = vmul.f32 %v867_v57, %v859_v54  ;;  %v875_v29 = vmul.f32 %v871_v46, %v860_v39  ;;  %947 = vmatprep.subr.bf16.mxu1 %v899_v53 }
 0x203   : > { %948 = vmatpush1.bf16.msra.mxu1 %v898_v52 }
 0x204   : > { %v900_v43 = vpack.c.bf16 %v874_v26, %v874_v26  ;;  %v901_v55 = vpack.c.bf16 %v875_v29, %v875_v29 }
 0x206   : > { %1080 = vmatprep.subr.msk.bf16.mxu1 %vm299_vm0, %v901_v55  ;;  %v920_v48 = vsel %vm299_vm0, %v900_v43, 0 }
 0x207   : > { %950 = vmatpush1.bf16.msra.mxu1 %v920_v48 }
 0x20a   : > { %958 = vmatmul.mubr.bf16.vlgmr.msra.gmra.mrb[0].mxu1 %v1078_v0 }
 0x211   : > { %v907_v45 = vpop.permute.xlu1 %906 }
 0x2dd   : > { %v959_v38 = vpop.f32.mrb[0].mxu1 }
 0x2de   : > { %v960_v20 = vadd.f32 %v959_v38, %v907_v45  ;;  %v961_v56 = vpop.f32.mrb[1].mxu1 }
 0x2df   : > { %v962_v59 = vadd.f32 %v961_v56, %v907_v45  ;;  %v963_v60 = vpop.f32.mrb[2].mxu1 }
 0x2e0   : > { %v966_v24 = vadd.f32 %v960_v20, %v1524_v2  ;;  %v964_v27 = vpop.f32.mrb[3].mxu1 }
 0x2e1   : > { %v967_v61 = vadd.f32 %v962_v59, %v1522_v1 }
 0x2e2   : > { %968 = vst [vmem:[%s282_s20] sm:$0xff] %v966_v24 }
 0x2e3   : > { %969 = vst [vmem:[%s282_s20 + $0x8] sm:$0xff] %v967_v61 }
 0x2e4   : > { %1248 = shalt.err (!%p1245_p7)
}
 0x2e5   : > { %s1249_s26 = scalar_lea.hbm %s1874_s16, 256  ;;  %s1253_s11 = scalar_lea.hbm %s1924_s6, 512 }
 0x2e6   : > { %p1250_p9 = scmp.ne.s32.totalorder %s1874_s16, %s1249_s26  ;;  %p1254_p0 = scmp.lt.u32.totalorder %s1874_s16, %s1924_s6 }
 0x2e7   : > { %p1255_p11 = scmp.lt.u32.totalorder %s1253_s11, %s1249_s26  ;;  %p1257_p4 = scmp.lt.u32.totalorder %s1249_s26, %s1874_s16 }
 0x2e8   : > { %p1251_p2 = pnand %p1250_p9, %p1463_p12 }
 0x2e9   : > { %p1256_p1 = por %p1255_p11, %p1254_p0 }
 0x2ea   : > { %p1252_p5 = pneg %p1251_p2 }
 0x2eb   : > { %p1258_p6 = por %p1257_p4, %p1256_p1 }
 0x2ed   : > { %p1259_p8 = pnand %p1258_p6, %p1252_p5 }
 0x2ef   : > { %1262 = shalt.err (!%p1259_p8)
}
 0x2f0   : > { %1095 = dma.vmem_to_hbm [thread:$0]  (%p1463_p12), %s1876_s18, 256, %s1874_s16, %s971_s25  }
 0x2f1 PF: > { %s997_s20 = sand.u32 1, %s1293_s21   ;;  %p1939_p10 = scmp.ne.s32.totalorder %s1929_s28, 0 }
 0x2f2   : > { %p1940_p13 = scmp.ge.s32.totalorder %s1305_s24, 2  ;;  %s998_s7 = scalar_lea.sflag [#allocation4], %s997_s20 }
 0x2f4   : > { %p1106_p3 = pnand %p1940_p13, %p1939_p10 }
 0x2f6   : > { %1288 = dma.done.wait (!%p1106_p3), %s998_s7, 256  }
 0x2f7   : > { %1290 = vsyncadd (!%p1106_p3), %s998_s7, 4294967040  ;;  %p20_p7 = scmp.ge.s32.totalorder %s1428_s9, 4   ;;  %s1941_s21 = smov %s1297_s22 }
 0x2f8   : > { %s1942_s22 = smov %s1301_s23  ;;  %s1943_s23 = smov %s1459_s13 }
 0x2f9   : > { %s1944_s24 = smov %s1428_s9  ;;  %22 = sbr.rel (!%p20_p7) target bundleno = 6 (0x6), region = 116 }
 0x300   :  { %1003 = vsyncpa [#allocation3], 1 }
 0x301   :  { %1005 = vsyncpa [#allocation3 + $0x1], 1 }
 0x302   :  { %1006 = vsyncpa [#allocation6], 1 }
 0x303   :  { %1007 = vsyncpa [#allocation4], 1 }
 0x304   :  { %1009 = vsyncpa [#allocation4 + $0x1], 1 }

</bundles_post_ra>
